<compile_context>
chip_gen: v7x
topology: tpu7x:2x2x1
jax: 0.10.0
libtpu: 0.0.40
codegen_flags: <defaults>
</compile_context>

<pallas_src>
import jax
import jax.numpy as jnp
from jax import lax
from jax.experimental import pallas as pl
from jax.experimental.pallas import tpu as pltpu

# MLP layer sizes from the PyTorch module.
LAYER_SIZES = [56, 128, 64, 32, 64, 128, 1]
DEFAULT_TB = 4096   # max batch tile (lane axis); multiple of 256
LANE_MULT = 256     # keep N a multiple of 256 (v6e/v7x MXU width)


def _round_up(x, m):
    return ((x + m - 1) // m) * m


def _mlp_kernel(x_ref,
                w1_ref, b1_ref,
                w2_ref, b2_ref,
                w3_ref, b3_ref,
                w4_ref, b4_ref,
                w5_ref, b5_ref,
                w6_ref, b6_ref,
                oT_ref):
    """Fused forward pass, batch-on-lanes inside the kernel.

    x_ref  : (tb, 56)  f32   untransposed input tile (batch, features)
    wN_ref : (out, in) bf16  PyTorch-native weight layout
    bN_ref : (out, 1)  f32   bias, broadcast across the lane (batch) axis
    oT_ref : (1, tb)   f32   transposed logits (lane-dense store)
    """
    x = x_ref[...].astype(jnp.bfloat16)  # (tb, 56) bf16, cast in-kernel

    # Layer 1: contract the feature dims of w1 (128, 56) and x (tb, 56)
    # -> (128, tb), i.e. activations land batch-on-lanes with no HBM transpose.
    acc = lax.dot_general(
        w1_ref[...], x,
        dimension_numbers=(((1,), (1,)), ((), ())),
        preferred_element_type=jnp.float32)
    h = jnp.maximum(acc + b1_ref[...], 0.0).astype(jnp.bfloat16)  # (128, tb)

    def dense_relu(h, w_ref, b_ref):
        acc = jnp.dot(w_ref[...], h, preferred_element_type=jnp.float32)
        return jnp.maximum(acc + b_ref[...], 0.0).astype(jnp.bfloat16)

    h = dense_relu(h, w2_ref, b2_ref)   # (64,  tb)
    h = dense_relu(h, w3_ref, b3_ref)   # (32,  tb)
    h = dense_relu(h, w4_ref, b4_ref)   # (64,  tb)
    h = dense_relu(h, w5_ref, b5_ref)   # (128, tb)

    # Final layer: no activation; (1, tb) result is already lane-dense.
    out = jnp.dot(w6_ref[...], h, preferred_element_type=jnp.float32) + b6_ref[...]
    oT_ref[...] = out.astype(oT_ref.dtype)


def init_params(key):
    """Deterministic init mimicking nn.Linear defaults: U(-1/sqrt(in), 1/sqrt(in)).

    Weights are (out_features, in_features) — PyTorch's native storage — and
    biases are (out_features, 1), both f32 master copies.
    """
    params = []
    for fan_in, fan_out in zip(LAYER_SIZES[:-1], LAYER_SIZES[1:]):
        key, kw, kb = jax.random.split(key, 3)
        bound = 1.0 / jnp.sqrt(jnp.float32(fan_in))
        w = jax.random.uniform(kw, (fan_out, fan_in), jnp.float32, -bound, bound)
        b = jax.random.uniform(kb, (fan_out, 1), jnp.float32, -bound, bound)
        params.append((w, b))
    return params


def mlp_forward(x, params, *, tb_max=DEFAULT_TB):
    """x: (B, 56) float32 (already flattened). Returns (B, 1) float32 logits."""
    B, F = x.shape
    assert F == LAYER_SIZES[0]
    x = x.astype(jnp.float32)  # no-op for f32 inputs; cast to bf16 is in-kernel

    # Batch tile on the lane axis: multiple of 256, no larger than needed.
    Bp0 = _round_up(B, LANE_MULT)
    tb = min(tb_max, Bp0)
    if Bp0 >= 2 * LANE_MULT:
        # v7x megacore: ensure >= 2 grid steps so both TensorCores get work.
        tb = min(tb, _round_up(pl.cdiv(Bp0, 2), LANE_MULT))
    Bp = _round_up(B, tb)
    num_tiles = Bp // tb

    # Explicit zero-pad only when needed (aligned batches pay nothing).
    if Bp != B:
        x = jnp.pad(x, ((0, Bp - B), (0, 0)))

    flat_params = []
    for w, b in params:
        flat_params += [w.astype(jnp.bfloat16), b.astype(jnp.float32)]

    # BlockSpecs: x/out are tiled along the batch axis; weights/biases use a
    # constant index_map so they stay VMEM-resident across grid steps.
    x_spec = pl.BlockSpec((tb, F), lambda i: (i, 0))
    param_specs = []
    for w, b in params:
        param_specs.append(pl.BlockSpec(w.shape, lambda i: (0, 0)))
        param_specs.append(pl.BlockSpec(b.shape, lambda i: (0, 0)))
    out_spec = pl.BlockSpec((1, tb), lambda i: (0, i))

    # Advisory cost estimate (per padded batch row: 2 * sum(in*out) flops).
    weight_elems = sum(i * o for i, o in zip(LAYER_SIZES[:-1], LAYER_SIZES[1:]))
    bias_elems = sum(LAYER_SIZES[1:])
    cost = pl.CostEstimate(
        flops=2 * weight_elems * Bp,
        transcendentals=0,
        bytes_accessed=Bp * (F * 4 + 4) + weight_elems * 2 + bias_elems * 4,
    )

    outT = pl.pallas_call(
        _mlp_kernel,
        out_shape=jax.ShapeDtypeStruct((1, Bp), jnp.float32),
        grid=(num_tiles,),
        in_specs=[x_spec] + param_specs,
        out_specs=out_spec,
        compiler_params=pltpu.CompilerParams(
            dimension_semantics=("parallel",),
            vmem_limit_bytes=32 * 1024 * 1024,
        ),
        cost_estimate=cost,
    )(x, *flat_params)

    # (1, Bp) -> (Bp, 1) is a pure relayout-free reshape; slice off padding.
    return outT.reshape(Bp, 1)[:B]


def forward(x_raw, params):
    """Full module forward: nn.Flatten + linear_relu_stack."""
    B = x_raw.shape[0]
    x = x_raw.reshape(B, -1).astype(jnp.float32)  # nn.Flatten (glue; plain JAX)
    return mlp_forward(x, params)


def _reference_forward(x_raw, params):
    """Pure-JAX f32 reference for a correctness sanity check."""
    h = x_raw.reshape(x_raw.shape[0], -1).astype(jnp.float32)
    for i, (w, b) in enumerate(params):
        h = h @ w.T + b.T
        if i < len(params) - 1:
            h = jnp.maximum(h, 0.0)
    return h


if __name__ == "__main__":
    key = jax.random.PRNGKey(0)
    kp, kx1, kx2 = jax.random.split(key, 3)

    params = init_params(kp)

    # Case 1: small batch, single tile, exercises Flatten: (8, 7, 8) -> (8, 56).
    x_small = jax.random.normal(kx1, (8, 7, 8), jnp.float32)
    out_small = jax.block_until_ready(forward(x_small, params))
    ref_small = _reference_forward(x_small, params)
    assert out_small.shape == (8, 1), out_small.shape
    assert jnp.allclose(out_small, ref_small, atol=5e-2, rtol=5e-2), (
        "kernel mismatch vs reference (small)", out_small, ref_small)

    # Case 2: multi-tile + padding path: B=300 (not a multiple of 128/256)
    # -> tb=256, 2 grid steps, 212 padded rows sliced off.
    x_big = jax.random.normal(kx2, (300, 56), jnp.float32)
    out_big = jax.block_until_ready(forward(x_big, params))
    ref_big = _reference_forward(x_big, params)
    assert out_big.shape == (300, 1), out_big.shape
    assert jnp.allclose(out_big, ref_big, atol=5e-2, rtol=5e-2), (
        "kernel mismatch vs reference (multi-tile)", out_big, ref_big)

    print("KERNEL_OK")
</pallas_src>

<mosaic_0001>
module attributes {stable_mosaic.version = 11 : i64} {
  func.func @_mlp_kernel(%arg0: i32, %arg1: memref<256x56xf32, #tpu.memory_space<vmem>>, %arg2: memref<128x56xbf16, #tpu.memory_space<vmem>>, %arg3: memref<128x1xf32, #tpu.memory_space<vmem>>, %arg4: memref<64x128xbf16, #tpu.memory_space<vmem>>, %arg5: memref<64x1xf32, #tpu.memory_space<vmem>>, %arg6: memref<32x64xbf16, #tpu.memory_space<vmem>>, %arg7: memref<32x1xf32, #tpu.memory_space<vmem>>, %arg8: memref<64x32xbf16, #tpu.memory_space<vmem>>, %arg9: memref<64x1xf32, #tpu.memory_space<vmem>>, %arg10: memref<128x64xbf16, #tpu.memory_space<vmem>>, %arg11: memref<128x1xf32, #tpu.memory_space<vmem>>, %arg12: memref<1x128xbf16, #tpu.memory_space<vmem>>, %arg13: memref<1x1xf32, #tpu.memory_space<vmem>>, %arg14: memref<1x256xf32, #tpu.memory_space<vmem>>) attributes {dimension_semantics = [#tpu.dimension_semantics<parallel>], iteration_bounds = array<i64: 1>, scalar_prefetch = 0 : i64, scratch_operands = 0 : i64, tpu.core_type = #tpu.core_type<tc>, window_params = [{transform_indices = @transform_0, window_bounds = array<i64: 256, 56>}, {pipeline_mode = #tpu.pipeline_mode<synchronous>, transform_indices = @transform_1, window_bounds = array<i64: 128, 56>}, {pipeline_mode = #tpu.pipeline_mode<synchronous>, transform_indices = @transform_2, window_bounds = array<i64: 128, 1>}, {pipeline_mode = #tpu.pipeline_mode<synchronous>, transform_indices = @transform_3, window_bounds = array<i64: 64, 128>}, {pipeline_mode = #tpu.pipeline_mode<synchronous>, transform_indices = @transform_4, window_bounds = array<i64: 64, 1>}, {pipeline_mode = #tpu.pipeline_mode<synchronous>, transform_indices = @transform_5, window_bounds = array<i64: 32, 64>}, {pipeline_mode = #tpu.pipeline_mode<synchronous>, transform_indices = @transform_6, window_bounds = array<i64: 32, 1>}, {pipeline_mode = #tpu.pipeline_mode<synchronous>, transform_indices = @transform_7, window_bounds = array<i64: 64, 32>}, {pipeline_mode = #tpu.pipeline_mode<synchronous>, transform_indices = @transform_8, window_bounds = array<i64: 64, 1>}, {pipeline_mode = #tpu.pipeline_mode<synchronous>, transform_indices = @transform_9, window_bounds = array<i64: 128, 64>}, {pipeline_mode = #tpu.pipeline_mode<synchronous>, transform_indices = @transform_10, window_bounds = array<i64: 128, 1>}, {pipeline_mode = #tpu.pipeline_mode<synchronous>, transform_indices = @transform_11, window_bounds = array<i64: 1, 128>}, {pipeline_mode = #tpu.pipeline_mode<synchronous>, transform_indices = @transform_12, window_bounds = array<i64: 1, 1>}, {transform_indices = @transform_13, window_bounds = array<i64: 1, 256>}]} {
    %c0 = arith.constant 0 : index
    %c0_0 = arith.constant 0 : index
    %0 = vector.load %arg1[%c0, %c0_0] : memref<256x56xf32, #tpu.memory_space<vmem>>, vector<256x56xf32>
    %1 = arith.truncf %0 : vector<256x56xf32> to vector<256x56xbf16>
    %c0_1 = arith.constant 0 : index
    %c0_2 = arith.constant 0 : index
    %2 = vector.load %arg2[%c0_1, %c0_2] : memref<128x56xbf16, #tpu.memory_space<vmem>>, vector<128x56xbf16>
    %cst = arith.constant dense<0.000000e+00> : vector<128x256xf32>
    %3 = tpu.matmul %2, %1, %cst {dimension_numbers = #tpu.dot_dimension_numbers<[1], [1], [0], [0], [0, 0, 1, 0], [], []>} : vector<128x56xbf16>, vector<256x56xbf16>, vector<128x256xf32> -> vector<128x256xf32>
    %c0_3 = arith.constant 0 : index
    %c0_4 = arith.constant 0 : index
    %4 = vector.load %arg3[%c0_3, %c0_4] : memref<128x1xf32, #tpu.memory_space<vmem>>, vector<128x1xf32>
    %5 = vector.broadcast %4 : vector<128x1xf32> to vector<128x256xf32>
    %6 = arith.addf %3, %5 : vector<128x256xf32>
    %cst_5 = arith.constant 0.000000e+00 : f32
    %7 = vector.broadcast %cst_5 : f32 to vector<128x256xf32>
    %8 = arith.maximumf %6, %7 : vector<128x256xf32>
    %9 = arith.truncf %8 : vector<128x256xf32> to vector<128x256xbf16>
    %c0_6 = arith.constant 0 : index
    %c0_7 = arith.constant 0 : index
    %10 = vector.load %arg4[%c0_6, %c0_7] : memref<64x128xbf16, #tpu.memory_space<vmem>>, vector<64x128xbf16>
    %cst_8 = arith.constant dense<0.000000e+00> : vector<64x256xf32>
    %11 = tpu.matmul %10, %9, %cst_8 {dimension_numbers = #tpu.dot_dimension_numbers<[1], [0], [0], [1], [0, 0, 1, 1], [], []>} : vector<64x128xbf16>, vector<128x256xbf16>, vector<64x256xf32> -> vector<64x256xf32>
    %c0_9 = arith.constant 0 : index
    %c0_10 = arith.constant 0 : index
    %12 = vector.load %arg5[%c0_9, %c0_10] : memref<64x1xf32, #tpu.memory_space<vmem>>, vector<64x1xf32>
    %13 = vector.broadcast %12 : vector<64x1xf32> to vector<64x256xf32>
    %14 = arith.addf %11, %13 : vector<64x256xf32>
    %cst_11 = arith.constant 0.000000e+00 : f32
    %15 = vector.broadcast %cst_11 : f32 to vector<64x256xf32>
    %16 = arith.maximumf %14, %15 : vector<64x256xf32>
    %17 = arith.truncf %16 : vector<64x256xf32> to vector<64x256xbf16>
    %c0_12 = arith.constant 0 : index
    %c0_13 = arith.constant 0 : index
    %18 = vector.load %arg6[%c0_12, %c0_13] : memref<32x64xbf16, #tpu.memory_space<vmem>>, vector<32x64xbf16>
    %cst_14 = arith.constant dense<0.000000e+00> : vector<32x256xf32>
    %19 = tpu.matmul %18, %17, %cst_14 {dimension_numbers = #tpu.dot_dimension_numbers<[1], [0], [0], [1], [0, 0, 1, 1], [], []>} : vector<32x64xbf16>, vector<64x256xbf16>, vector<32x256xf32> -> vector<32x256xf32>
    %c0_15 = arith.constant 0 : index
    %c0_16 = arith.constant 0 : index
    %20 = vector.load %arg7[%c0_15, %c0_16] : memref<32x1xf32, #tpu.memory_space<vmem>>, vector<32x1xf32>
    %21 = vector.broadcast %20 : vector<32x1xf32> to vector<32x256xf32>
    %22 = arith.addf %19, %21 : vector<32x256xf32>
    %cst_17 = arith.constant 0.000000e+00 : f32
    %23 = vector.broadcast %cst_17 : f32 to vector<32x256xf32>
    %24 = arith.maximumf %22, %23 : vector<32x256xf32>
    %25 = arith.truncf %24 : vector<32x256xf32> to vector<32x256xbf16>
    %c0_18 = arith.constant 0 : index
    %c0_19 = arith.constant 0 : index
    %26 = vector.load %arg8[%c0_18, %c0_19] : memref<64x32xbf16, #tpu.memory_space<vmem>>, vector<64x32xbf16>
    %cst_20 = arith.constant dense<0.000000e+00> : vector<64x256xf32>
    %27 = tpu.matmul %26, %25, %cst_20 {dimension_numbers = #tpu.dot_dimension_numbers<[1], [0], [0], [1], [0, 0, 1, 1], [], []>} : vector<64x32xbf16>, vector<32x256xbf16>, vector<64x256xf32> -> vector<64x256xf32>
    %c0_21 = arith.constant 0 : index
    %c0_22 = arith.constant 0 : index
    %28 = vector.load %arg9[%c0_21, %c0_22] : memref<64x1xf32, #tpu.memory_space<vmem>>, vector<64x1xf32>
    %29 = vector.broadcast %28 : vector<64x1xf32> to vector<64x256xf32>
    %30 = arith.addf %27, %29 : vector<64x256xf32>
    %cst_23 = arith.constant 0.000000e+00 : f32
    %31 = vector.broadcast %cst_23 : f32 to vector<64x256xf32>
    %32 = arith.maximumf %30, %31 : vector<64x256xf32>
    %33 = arith.truncf %32 : vector<64x256xf32> to vector<64x256xbf16>
    %c0_24 = arith.constant 0 : index
    %c0_25 = arith.constant 0 : index
    %34 = vector.load %arg10[%c0_24, %c0_25] : memref<128x64xbf16, #tpu.memory_space<vmem>>, vector<128x64xbf16>
    %cst_26 = arith.constant dense<0.000000e+00> : vector<128x256xf32>
    %35 = tpu.matmul %34, %33, %cst_26 {dimension_numbers = #tpu.dot_dimension_numbers<[1], [0], [0], [1], [0, 0, 1, 1], [], []>} : vector<128x64xbf16>, vector<64x256xbf16>, vector<128x256xf32> -> vector<128x256xf32>
    %c0_27 = arith.constant 0 : index
    %c0_28 = arith.constant 0 : index
    %36 = vector.load %arg11[%c0_27, %c0_28] : memref<128x1xf32, #tpu.memory_space<vmem>>, vector<128x1xf32>
    %37 = vector.broadcast %36 : vector<128x1xf32> to vector<128x256xf32>
    %38 = arith.addf %35, %37 : vector<128x256xf32>
    %cst_29 = arith.constant 0.000000e+00 : f32
    %39 = vector.broadcast %cst_29 : f32 to vector<128x256xf32>
    %40 = arith.maximumf %38, %39 : vector<128x256xf32>
    %41 = arith.truncf %40 : vector<128x256xf32> to vector<128x256xbf16>
    %c0_30 = arith.constant 0 : index
    %c0_31 = arith.constant 0 : index
    %42 = vector.load %arg12[%c0_30, %c0_31] : memref<1x128xbf16, #tpu.memory_space<vmem>>, vector<1x128xbf16>
    %cst_32 = arith.constant dense<0.000000e+00> : vector<1x256xf32>
    %43 = tpu.matmul %42, %41, %cst_32 {dimension_numbers = #tpu.dot_dimension_numbers<[1], [0], [0], [1], [0, 0, 1, 1], [], []>} : vector<1x128xbf16>, vector<128x256xbf16>, vector<1x256xf32> -> vector<1x256xf32>
    %c0_33 = arith.constant 0 : index
    %c0_34 = arith.constant 0 : index
    %44 = vector.load %arg13[%c0_33, %c0_34] : memref<1x1xf32, #tpu.memory_space<vmem>>, vector<1x1xf32>
    %45 = vector.broadcast %44 : vector<1x1xf32> to vector<1x256xf32>
    %46 = arith.addf %43, %45 : vector<1x256xf32>
    %c0_35 = arith.constant 0 : index
    %c0_36 = arith.constant 0 : index
    %47 = vector.load %arg14[%c0_35, %c0_36] : memref<1x256xf32, #tpu.memory_space<vmem>>, vector<1x256xf32>
    tpu.vector_store %arg14[%c0_35, %c0_36], %46 {strides = array<i32>} : memref<1x256xf32, #tpu.memory_space<vmem>>, vector<1x256xf32>,
    return
  }
  func.func @transform_0(%arg0: i32) -> (i32, i32) {
    %c0_i32 = arith.constant 0 : i32
    %c0_i32_0 = arith.constant 0 : i32
    return %arg0, %c0_i32 : i32, i32
  }
  func.func @transform_1(%arg0: i32) -> (i32, i32) {
    %c0_i32 = arith.constant 0 : i32
    %c0_i32_0 = arith.constant 0 : i32
    %c0_i32_1 = arith.constant 0 : i32
    return %c0_i32, %c0_i32_0 : i32, i32
  }
  func.func @transform_2(%arg0: i32) -> (i32, i32) {
    %c0_i32 = arith.constant 0 : i32
    %c0_i32_0 = arith.constant 0 : i32
    %c0_i32_1 = arith.constant 0 : i32
    return %c0_i32, %c0_i32_0 : i32, i32
  }
  func.func @transform_3(%arg0: i32) -> (i32, i32) {
    %c0_i32 = arith.constant 0 : i32
    %c0_i32_0 = arith.constant 0 : i32
    %c0_i32_1 = arith.constant 0 : i32
    return %c0_i32, %c0_i32_0 : i32, i32
  }
  func.func @transform_4(%arg0: i32) -> (i32, i32) {
    %c0_i32 = arith.constant 0 : i32
    %c0_i32_0 = arith.constant 0 : i32
    %c0_i32_1 = arith.constant 0 : i32
    return %c0_i32, %c0_i32_0 : i32, i32
  }
  func.func @transform_5(%arg0: i32) -> (i32, i32) {
    %c0_i32 = arith.constant 0 : i32
    %c0_i32_0 = arith.constant 0 : i32
    %c0_i32_1 = arith.constant 0 : i32
    return %c0_i32, %c0_i32_0 : i32, i32
  }
  func.func @transform_6(%arg0: i32) -> (i32, i32) {
    %c0_i32 = arith.constant 0 : i32
    %c0_i32_0 = arith.constant 0 : i32
    %c0_i32_1 = arith.constant 0 : i32
    return %c0_i32, %c0_i32_0 : i32, i32
  }
  func.func @transform_7(%arg0: i32) -> (i32, i32) {
    %c0_i32 = arith.constant 0 : i32
    %c0_i32_0 = arith.constant 0 : i32
    %c0_i32_1 = arith.constant 0 : i32
    return %c0_i32, %c0_i32_0 : i32, i32
  }
  func.func @transform_8(%arg0: i32) -> (i32, i32) {
    %c0_i32 = arith.constant 0 : i32
    %c0_i32_0 = arith.constant 0 : i32
    %c0_i32_1 = arith.constant 0 : i32
    return %c0_i32, %c0_i32_0 : i32, i32
  }
  func.func @transform_9(%arg0: i32) -> (i32, i32) {
    %c0_i32 = arith.constant 0 : i32
    %c0_i32_0 = arith.constant 0 : i32
    %c0_i32_1 = arith.constant 0 : i32
    return %c0_i32, %c0_i32_0 : i32, i32
  }
  func.func @transform_10(%arg0: i32) -> (i32, i32) {
    %c0_i32 = arith.constant 0 : i32
    %c0_i32_0 = arith.constant 0 : i32
    %c0_i32_1 = arith.constant 0 : i32
    return %c0_i32, %c0_i32_0 : i32, i32
  }
  func.func @transform_11(%arg0: i32) -> (i32, i32) {
    %c0_i32 = arith.constant 0 : i32
    %c0_i32_0 = arith.constant 0 : i32
    %c0_i32_1 = arith.constant 0 : i32
    return %c0_i32, %c0_i32_0 : i32, i32
  }
  func.func @transform_12(%arg0: i32) -> (i32, i32) {
    %c0_i32 = arith.constant 0 : i32
    %c0_i32_0 = arith.constant 0 : i32
    %c0_i32_1 = arith.constant 0 : i32
    return %c0_i32, %c0_i32_0 : i32, i32
  }
  func.func @transform_13(%arg0: i32) -> (i32, i32) {
    %c0_i32 = arith.constant 0 : i32
    %c0_i32_0 = arith.constant 0 : i32
    return %c0_i32, %arg0 : i32, i32
  }
}

</mosaic_0001>

<bundles_post_ra>
// kernel: tpu_custom_call.1
= control target key start
LH: loop header
LB: loop body
LE: loop exit
PB: predicated region body
PF: predicated region fallthrough
CT: control target
= control target key end

     0   :  { %s2012_s0 = inlined_call_operand.vmem [shape: f32[256,56], index: 0, kind: input, shape index: {}]   ;;  %s2013_s1 = inlined_call_operand.vmem [shape: bf16[128,56], index: 1, kind: input, shape index: {}]   ;;  %s2014_s2 = inlined_call_operand.vmem [shape: f32[128,1], index: 2, kind: input, shape index: {}]   ;;  %s2015_s3 = inlined_call_operand.vmem [shape: bf16[64,128], index: 3, kind: input, shape index: {}]   ;;  %s2016_s4 = inlined_call_operand.vmem [shape: f32[64,1], index: 4, kind: input, shape index: {}]   ;;  %s2017_s5 = inlined_call_operand.vmem [shape: bf16[32,64], index: 5, kind: input, shape index: {}]   ;;  %s2018_s6 = inlined_call_operand.vmem [shape: f32[32,1], index: 6, kind: input, shape index: {}]   ;;  %s2019_s7 = inlined_call_operand.vmem [shape: bf16[64,32], index: 7, kind: input, shape index: {}]   ;;  %s2020_s8 = inlined_call_operand.vmem [shape: f32[64,1], index: 8, kind: input, shape index: {}]   ;;  %s2021_s9 = inlined_call_operand.vmem [shape: bf16[128,64], index: 9, kind: input, shape index: {}]   ;;  %s2022_s10 = inlined_call_operand.vmem [shape: f32[128,1], index: 10, kind: input, shape index: {}]   ;;  %s2023_s11 = inlined_call_operand.vmem [shape: bf16[1,128], index: 11, kind: input, shape index: {}]   ;;  %s2024_s12 = inlined_call_operand.<no memory space> [shape: f32[1,1], index: 12, kind: input, shape index: {}]   ;;  %s2025_s13 = inlined_call_operand.hbm [shape: f32[1,256], index: 13, kind: output, shape index: {}]  }
   0x1   :  { %v18_v0 = vstv %s2024_s12 }
   0x2   :  { %19 = vst [vmem:[#allocation2] sm:$0x1] %v18_v0 }
   0x3   :  { %v64_v1 = vld [vmem:[%s2012_s0 + $0x80] sm:$0xff]  ;;  %v65_v2 = vld [vmem:[%s2012_s0 + $0x88] sm:$0xff]  ;;  %vm248_vm0 = vcmask 457728   ;;  %v66_v6 = vld [vmem:[%s2012_s0 + $0x90] sm:$0xff]  ;;  %v1524_v8 = vmov 0  }
   0x4   :  { %v48_v3 = vld [vmem:[%s2012_s0] sm:$0xff]  ;;  %v88_v4 = vpack.c.bf16 %v65_v2, %v64_v1  ;;  %v49_v5 = vld [vmem:[%s2012_s0 + $0x8] sm:$0xff]  ;;  %v67_v7 = vld [vmem:[%s2012_s0 + $0x98] sm:$0xff]  ;;  %1472 = vset.pattern.permute.xlu0 %v1524_v8  ;;  %1473 = vset.pattern.permute.xlu1 %v1524_v8 }
   0x5   :  { %v80_v9 = vpack.c.bf16 %v49_v5, %v48_v3  ;;  %v89_v10 = vpack.c.bf16 %v67_v7, %v66_v6  ;;  %736 = vmatprep.mubr.bf16.mxu1 %v1524_v8  ;;  %v50_v11 = vld [vmem:[%s2012_s0 + $0x10] sm:$0xff]  ;;  %v51_v12 = vld [vmem:[%s2012_s0 + $0x18] sm:$0xff]  ;;  %v68_v15 = vld [vmem:[%s2012_s0 + $0xa0] sm:$0xff] }
   0x6   :  { %1461 = vmatprep.subr.msk.bf16.mxu0 %vm248_vm0, %v88_v4  ;;  %v81_v14 = vpack.c.bf16 %v51_v12, %v50_v11  ;;  %v69_v16 = vld [vmem:[%s2012_s0 + $0xa8] sm:$0xff]  ;;  %v112_v17 = vld [vmem:[%s2014_s2] sm:$0xff]  ;;  %v114_v21 = vld [vmem:[%s2014_s2 + $0x10] sm:$0xff] }
   0x7   :  { %v274_v13 = vsel %vm248_vm0, %v80_v9, 0  ;;  %130 = vperm.xlu0 %1472, %v112_v17   ;;  %v90_v19 = vpack.c.bf16 %v69_v16, %v68_v15  ;;  %v113_v20 = vld [vmem:[%s2014_s2 + $0x8] sm:$0xff]  ;;  %v52_v22 = vld [vmem:[%s2012_s0 + $0x20] sm:$0xff]  ;;  %140 = vperm.xlu1 %1473, %v114_v21   ;;  %v115_v24 = vld [vmem:[%s2014_s2 + $0x18] sm:$0xff] }
   0x8   :  { %1430 = vmatpush3.bf16.xpose.msra.mxu0 %v274_v13  ;;  %v277_v18 = vsel %vm248_vm0, %v81_v14, 0  ;;  %v53_v23 = vld [vmem:[%s2012_s0 + $0x28] sm:$0xff]  ;;  %v116_v26 = vld [vmem:[%s2014_s2 + $0x20] sm:$0xff]  ;;  %v70_v28 = vld [vmem:[%s2012_s0 + $0xb0] sm:$0xff] }
   0x9   :  { %1462 = vmatprep.subr.msk.bf16.mxu0 %vm248_vm0, %v89_v10  ;;  %v82_v25 = vpack.c.bf16 %v53_v23, %v52_v22  ;;  %v1662_v27 = vld [vmem:[%s2013_s1] sm:$0xff]   ;;  %v71_v29 = vld [vmem:[%s2012_s0 + $0xb8] sm:$0xff]  ;;  %v117_v30 = vld [vmem:[%s2014_s2 + $0x28] sm:$0xff] }
   0xa   :  { %1445 = vmatprep.mubr.msk.bf16.mxu0 %vm248_vm0, %v1662_v27  ;;  %v91_v32 = vpack.c.bf16 %v71_v29, %v70_v28  ;;  %v118_v33 = vld [vmem:[%s2014_s2 + $0x30] sm:$0xff]  ;;  %v55_v35 = vld [vmem:[%s2012_s0 + $0x38] sm:$0xff]  ;;  %v72_v38 = vld [vmem:[%s2012_s0 + $0xc0] sm:$0xff] }
   0xb   :  { %135 = vperm.xlu0 %1472, %v113_v20   ;;  %145 = vperm.xlu1 %1473, %v115_v24   ;;  %v280_v31 = vsel %vm248_vm0, %v82_v25, 0  ;;  %v54_v34 = vld [vmem:[%s2012_s0 + $0x30] sm:$0xff]  ;;  %v119_v36 = vld [vmem:[%s2014_s2 + $0x38] sm:$0xff]  ;;  %v120_v39 = vld [vmem:[%s2014_s2 + $0x40] sm:$0xff] }
   0xc   :  { %v83_v37 = vpack.c.bf16 %v55_v35, %v54_v34  ;;  %v73_v40 = vld [vmem:[%s2012_s0 + $0xc8] sm:$0xff]  ;;  %v122_v44 = vld [vmem:[%s2014_s2 + $0x50] sm:$0xff]  ;;  %v56_v45 = vld [vmem:[%s2012_s0 + $0x40] sm:$0xff] }
   0xd   :  { %v121_v41 = vld [vmem:[%s2014_s2 + $0x48] sm:$0xff]  ;;  %v92_v43 = vpack.c.bf16 %v73_v40, %v72_v38  ;;  %v123_v47 = vld [vmem:[%s2014_s2 + $0x58] sm:$0xff]  ;;  %v58_v48 = vld [vmem:[%s2012_s0 + $0x50] sm:$0xff] }
   0xe   :  { %v283_v42 = vsel %vm248_vm0, %v83_v37, 0  ;;  %v57_v46 = vld [vmem:[%s2012_s0 + $0x48] sm:$0xff]  ;;  %v59_v49 = vld [vmem:[%s2012_s0 + $0x58] sm:$0xff]  ;;  %v124_v51 = vld [vmem:[%s2014_s2 + $0x60] sm:$0xff] }
   0xf   :  { %150 = vperm.xlu0 %1472, %v116_v26   ;;  %155 = vperm.xlu1 %1473, %v117_v30   ;;  %v84_v50 = vpack.c.bf16 %v57_v46, %v56_v45  ;;  %v74_v52 = vld [vmem:[%s2012_s0 + $0xd0] sm:$0xff]  ;;  %v75_v53 = vld [vmem:[%s2012_s0 + $0xd8] sm:$0xff]  ;;  %v85_v54 = vpack.c.bf16 %v59_v49, %v58_v48  ;;  %v125_v55 = vld [vmem:[%s2014_s2 + $0x68] sm:$0xff] }
  0x10   :  { %1432 = vmatpush3.bf16.xpose.msra.mxu0 %v277_v18  ;;  %v93_v57 = vpack.c.bf16 %v75_v53, %v74_v52  ;;  %v126_v58 = vld [vmem:[%s2014_s2 + $0x70] sm:$0xff]  ;;  %v490_v60 = vld [vmem:[%s2016_s4] sm:$0xff]  ;;  %v127_v61 = vld [vmem:[%s2014_s2 + $0x78] sm:$0xff] }
  0x11   :  { %1463 = vmatprep.subr.msk.bf16.mxu0 %vm248_vm0, %v90_v19  ;;  %v286_v56 = vsel %vm248_vm0, %v84_v50, 0  ;;  %v289_v59 = vsel %vm248_vm0, %v85_v54, 0  ;;  %v76_v62 = vld [vmem:[%s2012_s0 + $0xe0] sm:$0xff]  ;;  %v77_v63 = vld [vmem:[%s2012_s0 + $0xe8] sm:$0xff]  ;;  %v492_v1 = vld [vmem:[%s2016_s4 + $0x10] sm:$0xff] }
  0x12   :  { %v491_v0 = vld [vmem:[%s2016_s4 + $0x8] sm:$0xff]  ;;  %v60_v2 = vld [vmem:[%s2012_s0 + $0x60] sm:$0xff]  ;;  %v94_v4 = vpack.c.bf16 %v77_v63, %v76_v62  ;;  %v493_v5 = vld [vmem:[%s2016_s4 + $0x18] sm:$0xff] }
  0x13   :  { %160 = vperm.xlu0 %1472, %v118_v33   ;;  %165 = vperm.xlu1 %1473, %v119_v36   ;;  %v61_v3 = vld [vmem:[%s2012_s0 + $0x68] sm:$0xff]  ;;  %v494_v6 = vld [vmem:[%s2016_s4 + $0x20] sm:$0xff]  ;;  %v78_v7 = vld [vmem:[%s2012_s0 + $0xf0] sm:$0xff] }
  0x14   :  { %v79_v9 = vld [vmem:[%s2012_s0 + $0xf8] sm:$0xff]  ;;  %v86_v10 = vpack.c.bf16 %v61_v3, %v60_v2  ;;  %v495_v11 = vld [vmem:[%s2016_s4 + $0x28] sm:$0xff] }
  0x17   :  { %170 = vperm.xlu0 %1472, %v120_v39   ;;  %175 = vperm.xlu1 %1473, %v121_v41  }
  0x18   :  { %1434 = vmatpush3.bf16.xpose.msra.mxu0 %v280_v31 }
  0x19   :  { %1464 = vmatprep.subr.msk.bf16.mxu0 %vm248_vm0, %v91_v32 }
  0x1b   :  { %180 = vperm.xlu0 %1472, %v122_v44   ;;  %185 = vperm.xlu1 %1473, %v123_v47  }
  0x1f   :  { %190 = vperm.xlu0 %1472, %v124_v51   ;;  %195 = vperm.xlu1 %1473, %v125_v55  }
  0x20   :  { %1436 = vmatpush3.bf16.xpose.msra.mxu0 %v283_v42 }
  0x21   :  { %1465 = vmatprep.subr.msk.bf16.mxu0 %vm248_vm0, %v92_v43 }
  0x23   :  { %200 = vperm.xlu0 %1472, %v126_v58   ;;  %205 = vperm.xlu1 %1473, %v127_v61  }
  0x27   :  { %500 = vperm.xlu0 %1472, %v490_v60   ;;  %505 = vperm.xlu1 %1473, %v491_v0  }
  0x28   :  { %1438 = vmatpush3.bf16.xpose.msra.mxu0 %v286_v56 }
  0x29   :  { %1466 = vmatprep.subr.msk.bf16.mxu0 %vm248_vm0, %v93_v57 }
  0x2b   :  { %510 = vperm.xlu0 %1472, %v492_v1   ;;  %515 = vperm.xlu1 %1473, %v493_v5  }
  0x30   :  { %1440 = vmatpush3.bf16.xpose.msra.mxu0 %v289_v59 }
  0x31   :  { %1467 = vmatprep.subr.msk.bf16.mxu0 %vm248_vm0, %v94_v4 }
  0x32   :  { %20 = vsyncpa [#allocation4], 0  ;;  %520 = vperm.xlu0 %1472, %v494_v6   ;;  %v292_v12 = vsel %vm248_vm0, %v86_v10, 0  ;;  %v95_v13 = vpack.c.bf16 %v79_v9, %v78_v7  ;;  %v496_v14 = vld [vmem:[%s2016_s4 + $0x30] sm:$0xff]  ;;  %v63_v16 = vld [vmem:[%s2012_s0 + $0x78] sm:$0xff]  ;;  %525 = vperm.xlu1 %1473, %v495_v11   ;;  %vm697_vm1 = vcmask 523264  }
  0x33   :  { %v62_v15 = vld [vmem:[%s2012_s0 + $0x70] sm:$0xff]  ;;  %v497_v17 = vld [vmem:[%s2016_s4 + $0x38] sm:$0xff]  ;;  %v663_v19 = vld [vmem:[%s2018_s6] sm:$0xff]  ;;  %vm845_vm2 = vcmask 261120   ;;  %s1526_s19 = smov [#allocation3]  }
  0x34   :  { %v87_v18 = vpack.c.bf16 %v63_v16, %v62_v15  ;;  %v664_v20 = vld [vmem:[%s2018_s6 + $0x8] sm:$0xff]  ;;  %v665_v22 = vld [vmem:[%s2018_s6 + $0x10] sm:$0xff]  ;;  %v666_v23 = vld [vmem:[%s2018_s6 + $0x18] sm:$0xff]  ;;  %s1373_s20 = sshll.u32 %s1526_s19, 4  ;;  %s1374_s20 = int_to_ptr.vmem [resolvable:$true] %s1373_s20 }
  0x35   :  { %v777_v24 = vld [vmem:[%s2020_s8] sm:$0xff]  ;;  %v778_v25 = vld [vmem:[%s2020_s8 + $0x8] sm:$0xff]  ;;  %v779_v28 = vld [vmem:[%s2020_s8 + $0x10] sm:$0xff]  ;;  %p1505_p1 = scmp.lt.s32.totalorder %s1374_s20, %s1374_s20 }
  0x36   :  { %530 = vperm.xlu0 %1472, %v496_v14   ;;  %535 = vperm.xlu1 %1473, %v497_v17   ;;  %v295_v21 = vsel %vm248_vm0, %v87_v18, 0  ;;  %v1475_v26 = vld [vmem:[%s2013_s1 + $0x8] sm:$0xff]   ;;  %v780_v29 = vld [vmem:[%s2020_s8 + $0x18] sm:$0xff]  ;;  %v781_v30 = vld [vmem:[%s2020_s8 + $0x20] sm:$0xff] }
  0x37   :  { %v782_v31 = vld [vmem:[%s2020_s8 + $0x28] sm:$0xff]  ;;  %v783_v32 = vld [vmem:[%s2020_s8 + $0x30] sm:$0xff]  ;;  %v784_v33 = vld [vmem:[%s2020_s8 + $0x38] sm:$0xff] }
  0x38   :  { %1442 = vmatpush3.bf16.xpose.msra.mxu0 %v292_v12  ;;  %v971_v34 = vld [vmem:[%s2022_s10] sm:$0xff]  ;;  %v972_v35 = vld [vmem:[%s2022_s10 + $0x8] sm:$0xff]  ;;  %v1477_v36 = vld [vmem:[%s2013_s1 + $0x18] sm:$0xff]  }
  0x39   :  { %1468 = vmatprep.subr.msk.bf16.mxu0 %vm248_vm0, %v95_v13  ;;  %v973_v37 = vld [vmem:[%s2022_s10 + $0x10] sm:$0xff]  ;;  %v974_v38 = vld [vmem:[%s2022_s10 + $0x18] sm:$0xff]  ;;  %v975_v39 = vld [vmem:[%s2022_s10 + $0x20] sm:$0xff] }
  0x3a   :  { %669 = vperm.xlu0 %1472, %v663_v19   ;;  %674 = vperm.xlu1 %1473, %v664_v20   ;;  %v976_v40 = vld [vmem:[%s2022_s10 + $0x28] sm:$0xff]  ;;  %v1478_v41 = vld [vmem:[%s2013_s1 + $0x20] sm:$0xff]   ;;  %v977_v42 = vld [vmem:[%s2022_s10 + $0x30] sm:$0xff] }
  0x3b   :  { %v978_v43 = vld [vmem:[%s2022_s10 + $0x38] sm:$0xff]  ;;  %v979_v44 = vld [vmem:[%s2022_s10 + $0x40] sm:$0xff]  ;;  %v980_v45 = vld [vmem:[%s2022_s10 + $0x48] sm:$0xff] }
  0x3c   :  { %v1479_v46 = vld [vmem:[%s2013_s1 + $0x28] sm:$0xff]   ;;  %v981_v47 = vld [vmem:[%s2022_s10 + $0x50] sm:$0xff]  ;;  %v982_v48 = vld [vmem:[%s2022_s10 + $0x58] sm:$0xff] }
  0x3d   :  { %v983_v49 = vld [vmem:[%s2022_s10 + $0x60] sm:$0xff]  ;;  %v984_v50 = vld [vmem:[%s2022_s10 + $0x68] sm:$0xff]  ;;  %v1480_v51 = vld [vmem:[%s2013_s1 + $0x30] sm:$0xff]  }
  0x3e   :  { %679 = vperm.xlu0 %1472, %v665_v22   ;;  %684 = vperm.xlu1 %1473, %v666_v23   ;;  %v985_v52 = vld [vmem:[%s2022_s10 + $0x70] sm:$0xff]  ;;  %v986_v53 = vld [vmem:[%s2022_s10 + $0x78] sm:$0xff]  ;;  %v1293_v54 = vld [vmem:[#allocation2] sm:$0x1] }
  0x3f   :  { %v1481_v55 = vld [vmem:[%s2013_s1 + $0x38] sm:$0xff]  }
  0x40   :  { %1444 = vmatpush3.bf16.xpose.msra.mxu0 %v295_v21 }
  0x42   :  { %787 = vperm.xlu0 %1472, %v777_v24   ;;  %792 = vperm.xlu1 %1473, %v778_v25  }
  0x46   :  { %797 = vperm.xlu0 %1472, %v779_v28   ;;  %802 = vperm.xlu1 %1473, %v780_v29  }
  0x47   :  { %1446 = vmatmul.mubr.msk.bf16.vlgmr.msra.gmra.mrb[0].mxu0 %vm248_vm0, %v1662_v27  ;;  %v1476_v27 = vld [vmem:[%s2013_s1 + $0x10] sm:$0xff]  }
  0x48   :  { %1447 = vmatprep.mubr.msk.bf16.mxu0 %vm248_vm0, %v1475_v26 }
  0x4a   :  { %807 = vperm.xlu0 %1472, %v781_v30   ;;  %812 = vperm.xlu1 %1473, %v782_v31  }
  0x4e   :  { %817 = vperm.xlu0 %1472, %v783_v32   ;;  %822 = vperm.xlu1 %1473, %v784_v33  }
  0x4f   :  { %1448 = vmatmul.mubr.msk.bf16.gmra.mrb[4].mxu0 %vm248_vm0, %v1475_v26 }
  0x50   :  { %1449 = vmatprep.mubr.msk.bf16.mxu0 %vm248_vm0, %v1476_v27 }
  0x52   :  { %989 = vperm.xlu0 %1472, %v971_v34   ;;  %994 = vperm.xlu1 %1473, %v972_v35  }
  0x56   :  { %999 = vperm.xlu0 %1472, %v973_v37   ;;  %1004 = vperm.xlu1 %1473, %v974_v38  }
  0x57   :  { %1450 = vmatmul.mubr.msk.bf16.gmra.mrb[8].mxu0 %vm248_vm0, %v1476_v27 }
  0x58   :  { %1451 = vmatprep.mubr.msk.bf16.mxu0 %vm248_vm0, %v1477_v36 }
  0x5a   :  { %1009 = vperm.xlu0 %1472, %v975_v39   ;;  %1014 = vperm.xlu1 %1473, %v976_v40  }
  0x5e   :  { %1019 = vperm.xlu0 %1472, %v977_v42   ;;  %1024 = vperm.xlu1 %1473, %v978_v43  }
  0x5f   :  { %1452 = vmatmul.mubr.msk.bf16.gmra.mrb[12].mxu0 %vm248_vm0, %v1477_v36 }
  0x60   :  { %1453 = vmatprep.mubr.msk.bf16.mxu0 %vm248_vm0, %v1478_v41 }
  0x62   :  { %1029 = vperm.xlu0 %1472, %v979_v44   ;;  %1034 = vperm.xlu1 %1473, %v980_v45  }
  0x66   :  { %1039 = vperm.xlu0 %1472, %v981_v47   ;;  %1044 = vperm.xlu1 %1473, %v982_v48  }
  0x67   :  { %1454 = vmatmul.mubr.msk.bf16.gmra.mrb[16].mxu0 %vm248_vm0, %v1478_v41 }
  0x68   :  { %1455 = vmatprep.mubr.msk.bf16.mxu0 %vm248_vm0, %v1479_v46 }
  0x6a   :  { %1049 = vperm.xlu0 %1472, %v983_v49   ;;  %1054 = vperm.xlu1 %1473, %v984_v50  }
  0x6e   :  { %1059 = vperm.xlu0 %1472, %v985_v52   ;;  %1064 = vperm.xlu1 %1473, %v986_v53  }
  0x6f   :  { %1456 = vmatmul.mubr.msk.bf16.gmra.mrb[20].mxu0 %vm248_vm0, %v1479_v46 }
  0x70   :  { %1457 = vmatprep.mubr.msk.bf16.mxu0 %vm248_vm0, %v1480_v51 }
  0x72   :  { %1296 = vperm.xlu0 %1472, %v1293_v54  }
  0x77   :  { %1458 = vmatmul.mubr.msk.bf16.gmra.mrb[24].mxu0 %vm248_vm0, %v1480_v51 }
  0x78   :  { %1459 = vmatprep.mubr.msk.bf16.mxu0 %vm248_vm0, %v1481_v55 }
  0x7f   :  { %1460 = vmatmul.mubr.msk.bf16.gmra.mrb[28].mxu0 %vm248_vm0, %v1481_v55 }
  0x80   :  { %594 = vmatprep.mubr.bf16.mxu0 %v1524_v8 }
  0x86   :  { %v131_v56 = vpop.permute.xlu0 %130  ;;  %v141_v1 = vpop.permute.xlu1 %140 }
  0x8a   :  { %v136_v60 = vpop.permute.xlu0 %135  ;;  %v146_v13 = vpop.permute.xlu1 %145 }
  0x8e   :  { %v151_v24 = vpop.permute.xlu0 %150  ;;  %v156_v30 = vpop.permute.xlu1 %155 }
  0x92   :  { %v161_v40 = vpop.permute.xlu0 %160  ;;  %v166_v45 = vpop.permute.xlu1 %165 }
 0x11a   :  { %v355_v57 = vpop.f32.mrb[0].mxu0 }
 0x11b   :  { %v356_v58 = vadd.f32 %v355_v57, %v131_v56  ;;  %v357_v59 = vpop.f32.mrb[1].mxu0 }
 0x11c   :  { %v358_v61 = vadd.f32 %v357_v59, %v131_v56  ;;  %v359_v62 = vpop.f32.mrb[2].mxu0  ;;  %v171_v56 = vpop.permute.xlu0 %170 }
 0x11d   :  { %v360_v63 = vadd.f32 %v359_v62, %v136_v60  ;;  %v361_v0 = vpop.f32.mrb[3].mxu0  ;;  %v434_v3 = vmax.f32 %v356_v58, 0.0 }
 0x11e   :  { %v362_v2 = vadd.f32 %v361_v0, %v136_v60  ;;  %v435_v5 = vmax.f32 %v358_v61, 0.0  ;;  %v176_v61 = vpop.permute.xlu1 %175 }
 0x11f   :  { %v436_v4 = vmax.f32 %v360_v63, 0.0 }
 0x120   :  { %v437_v6 = vmax.f32 %v362_v2, 0.0 }
 0x121   :  { %v466_v7 = vpack.c.bf16 %v436_v4, %v434_v3 }
 0x122   :  { %v467_v9 = vpack.c.bf16 %v437_v6, %v435_v5  ;;  %v365_v10 = vpop.f32.mrb[4].mxu0 }
 0x123   :  { %v366_v11 = vadd.f32 %v365_v10, %v141_v1  ;;  %v367_v12 = vpop.f32.mrb[5].mxu0 }
 0x124   :  { %v368_v14 = vadd.f32 %v367_v12, %v141_v1  ;;  %v369_v15 = vpop.f32.mrb[6].mxu0  ;;  %562 = vmatprep.subr.bf16.mxu0 %v467_v9  ;;  %v181_v9 = vpop.permute.xlu0 %180 }
 0x125   :  { %v370_v16 = vadd.f32 %v369_v15, %v146_v13  ;;  %v371_v17 = vpop.f32.mrb[7].mxu0  ;;  %563 = vmatpush1.bf16.msra.mxu0 %v466_v7  ;;  %v438_v19 = vmax.f32 %v366_v11, 0.0 }
 0x126   :  { %v372_v18 = vadd.f32 %v371_v17, %v146_v13  ;;  %v439_v21 = vmax.f32 %v368_v14, 0.0  ;;  %v186_v14 = vpop.permute.xlu1 %185 }
 0x127   :  { %v440_v20 = vmax.f32 %v370_v16, 0.0 }
 0x128   :  { %v441_v22 = vmax.f32 %v372_v18, 0.0 }
 0x129   :  { %v468_v23 = vpack.c.bf16 %v440_v20, %v438_v19 }
 0x12a   :  { %v469_v25 = vpack.c.bf16 %v441_v22, %v439_v21  ;;  %v375_v26 = vpop.f32.mrb[8].mxu0 }
 0x12b   :  { %v376_v28 = vadd.f32 %v375_v26, %v151_v24  ;;  %v377_v29 = vpop.f32.mrb[9].mxu0 }
 0x12c   :  { %v378_v31 = vadd.f32 %v377_v29, %v151_v24  ;;  %v379_v27 = vpop.f32.mrb[10].mxu0  ;;  %564 = vmatprep.subr.bf16.mxu0 %v469_v25  ;;  %v191_v25 = vpop.permute.xlu0 %190 }
 0x12d   :  { %v380_v32 = vadd.f32 %v379_v27, %v156_v30  ;;  %v381_v33 = vpop.f32.mrb[11].mxu0  ;;  %565 = vmatpush1.bf16.msra.mxu0 %v468_v23  ;;  %v442_v35 = vmax.f32 %v376_v28, 0.0 }
 0x12e   :  { %v382_v34 = vadd.f32 %v381_v33, %v156_v30  ;;  %v443_v37 = vmax.f32 %v378_v31, 0.0  ;;  %v196_v31 = vpop.permute.xlu1 %195 }
 0x12f   :  { %v444_v36 = vmax.f32 %v380_v32, 0.0 }
 0x130   :  { %v445_v38 = vmax.f32 %v382_v34, 0.0 }
 0x131   :  { %v470_v39 = vpack.c.bf16 %v444_v36, %v442_v35 }
 0x132   :  { %v471_v41 = vpack.c.bf16 %v445_v38, %v443_v37  ;;  %v385_v42 = vpop.f32.mrb[12].mxu0 }
 0x133   :  { %v386_v43 = vadd.f32 %v385_v42, %v161_v40  ;;  %v387_v44 = vpop.f32.mrb[13].mxu0 }
 0x134   :  { %v388_v46 = vadd.f32 %v387_v44, %v161_v40  ;;  %v389_v47 = vpop.f32.mrb[14].mxu0  ;;  %566 = vmatprep.subr.bf16.mxu0 %v471_v41  ;;  %v201_v41 = vpop.permute.xlu0 %200 }
 0x135   :  { %v390_v48 = vadd.f32 %v389_v47, %v166_v45  ;;  %v391_v49 = vpop.f32.mrb[15].mxu0  ;;  %567 = vmatpush1.bf16.msra.mxu0 %v470_v39  ;;  %v446_v51 = vmax.f32 %v386_v43, 0.0 }
 0x136   :  { %v392_v50 = vadd.f32 %v391_v49, %v166_v45  ;;  %v447_v53 = vmax.f32 %v388_v46, 0.0  ;;  %v206_v46 = vpop.permute.xlu1 %205 }
 0x137   :  { %v448_v52 = vmax.f32 %v390_v48, 0.0 }
 0x138   :  { %v449_v54 = vmax.f32 %v392_v50, 0.0 }
 0x139   :  { %v472_v55 = vpack.c.bf16 %v448_v52, %v446_v51 }
 0x13a   :  { %v473_v57 = vpack.c.bf16 %v449_v54, %v447_v53  ;;  %v395_v58 = vpop.f32.mrb[16].mxu0 }
 0x13b   :  { %v396_v59 = vadd.f32 %v395_v58, %v171_v56  ;;  %v397_v60 = vpop.f32.mrb[17].mxu0  ;;  %v1482_v58 = vld [vmem:[%s2015_s3] sm:$0xff]  }
 0x13c   :  { %v398_v62 = vadd.f32 %v397_v60, %v171_v56  ;;  %v399_v63 = vpop.f32.mrb[18].mxu0  ;;  %568 = vmatprep.subr.bf16.mxu0 %v473_v57  ;;  %v1484_v60 = vld [vmem:[%s2015_s3 + $0x10] sm:$0xff]  }
 0x13d   :  { %v400_v0 = vadd.f32 %v399_v63, %v176_v61  ;;  %v401_v1 = vpop.f32.mrb[19].mxu0  ;;  %569 = vmatpush1.bf16.msra.mxu0 %v472_v55  ;;  %v450_v3 = vmax.f32 %v396_v59, 0.0  ;;  %v1483_v59 = vld [vmem:[%s2015_s3 + $0x8] sm:$0xff]  }
 0x13e   :  { %v402_v2 = vadd.f32 %v401_v1, %v176_v61  ;;  %v451_v5 = vmax.f32 %v398_v62, 0.0  ;;  %v1485_v61 = vld [vmem:[%s2015_s3 + $0x18] sm:$0xff]   ;;  %v501_v62 = vpop.permute.xlu0 %500 }
 0x13f   :  { %v452_v4 = vmax.f32 %v400_v0, 0.0 }
 0x140   :  { %v453_v6 = vmax.f32 %v402_v2, 0.0  ;;  %v506_v2 = vpop.permute.xlu1 %505 }
 0x141   :  { %v474_v7 = vpack.c.bf16 %v452_v4, %v450_v3 }
 0x142   :  { %v475_v10 = vpack.c.bf16 %v453_v6, %v451_v5  ;;  %v405_v11 = vpop.f32.mrb[20].mxu0 }
 0x143   :  { %v406_v12 = vadd.f32 %v405_v11, %v181_v9  ;;  %v407_v13 = vpop.f32.mrb[21].mxu0 }
 0x144   :  { %v408_v15 = vadd.f32 %v407_v13, %v181_v9  ;;  %v409_v16 = vpop.f32.mrb[22].mxu0  ;;  %570 = vmatprep.subr.bf16.mxu0 %v475_v10 }
 0x145   :  { %v410_v17 = vadd.f32 %v409_v16, %v186_v14  ;;  %v411_v18 = vpop.f32.mrb[23].mxu0  ;;  %571 = vmatpush1.bf16.msra.mxu0 %v474_v7  ;;  %v454_v20 = vmax.f32 %v406_v12, 0.0 }
 0x146   :  { %v412_v19 = vadd.f32 %v411_v18, %v186_v14  ;;  %v455_v22 = vmax.f32 %v408_v15, 0.0  ;;  %v511_v14 = vpop.permute.xlu0 %510 }
 0x147   :  { %v456_v21 = vmax.f32 %v410_v17, 0.0 }
 0x148   :  { %v457_v23 = vmax.f32 %v412_v19, 0.0  ;;  %v516_v19 = vpop.permute.xlu1 %515 }
 0x149   :  { %v476_v24 = vpack.c.bf16 %v456_v21, %v454_v20 }
 0x14a   :  { %v477_v26 = vpack.c.bf16 %v457_v23, %v455_v22  ;;  %v415_v28 = vpop.f32.mrb[24].mxu0 }
 0x14b   :  { %v416_v29 = vadd.f32 %v415_v28, %v191_v25  ;;  %v417_v30 = vpop.f32.mrb[25].mxu0 }
 0x14c   :  { %v418_v27 = vadd.f32 %v417_v30, %v191_v25  ;;  %v419_v32 = vpop.f32.mrb[26].mxu0  ;;  %572 = vmatprep.subr.bf16.mxu0 %v477_v26 }
 0x14d   :  { %v420_v33 = vadd.f32 %v419_v32, %v196_v31  ;;  %v421_v34 = vpop.f32.mrb[27].mxu0  ;;  %573 = vmatpush1.bf16.msra.mxu0 %v476_v24  ;;  %v458_v36 = vmax.f32 %v416_v29, 0.0 }
 0x14e   :  { %v422_v35 = vadd.f32 %v421_v34, %v196_v31  ;;  %v459_v38 = vmax.f32 %v418_v27, 0.0  ;;  %v521_v31 = vpop.permute.xlu0 %520 }
 0x14f   :  { %v460_v37 = vmax.f32 %v420_v33, 0.0 }
 0x150   :  { %v461_v39 = vmax.f32 %v422_v35, 0.0  ;;  %v526_v35 = vpop.permute.xlu1 %525 }
 0x151   :  { %v478_v40 = vpack.c.bf16 %v460_v37, %v458_v36 }
 0x152   :  { %v479_v42 = vpack.c.bf16 %v461_v39, %v459_v38  ;;  %v425_v43 = vpop.f32.mrb[28].mxu0 }
 0x153   :  { %v426_v44 = vadd.f32 %v425_v43, %v201_v41  ;;  %v427_v45 = vpop.f32.mrb[29].mxu0 }
 0x154   :  { %v428_v47 = vadd.f32 %v427_v45, %v201_v41  ;;  %v429_v48 = vpop.f32.mrb[30].mxu0  ;;  %574 = vmatprep.subr.bf16.mxu0 %v479_v42 }
 0x155   :  { %v430_v49 = vadd.f32 %v429_v48, %v206_v46  ;;  %v431_v50 = vpop.f32.mrb[31].mxu0  ;;  %575 = vmatpush1.bf16.msra.mxu0 %v478_v40  ;;  %v462_v52 = vmax.f32 %v426_v44, 0.0 }
 0x156   :  { %v432_v51 = vadd.f32 %v431_v50, %v206_v46  ;;  %v463_v54 = vmax.f32 %v428_v47, 0.0  ;;  %v531_v46 = vpop.permute.xlu0 %530 }
 0x157   :  { %v464_v53 = vmax.f32 %v430_v49, 0.0 }
 0x158   :  { %v465_v55 = vmax.f32 %v432_v51, 0.0  ;;  %v536_v51 = vpop.permute.xlu1 %535 }
 0x159   :  { %v480_v56 = vpack.c.bf16 %v464_v53, %v462_v52 }
 0x15a   :  { %v481_v57 = vpack.c.bf16 %v465_v55, %v463_v54 }
 0x15c   :  { %576 = vmatprep.subr.bf16.mxu0 %v481_v57 }
 0x15d   :  { %577 = vmatpush1.bf16.msra.mxu0 %v480_v56 }
 0x160   :  { %595 = vmatmul.mubr.bf16.vlgmr.msra.gmra.mrb[32].mxu0 %v1482_v58 }
 0x161   :  { %604 = vmatprep.mubr.bf16.mxu0 %v1524_v8 }
 0x168   :  { %605 = vmatmul.mubr.bf16.gmra.mrb[36].mxu0 %v1483_v59 }
 0x169   :  { %614 = vmatprep.mubr.bf16.mxu0 %v1524_v8 }
 0x170   :  { %615 = vmatmul.mubr.bf16.gmra.mrb[40].mxu0 %v1484_v60 }
 0x171   :  { %624 = vmatprep.mubr.bf16.mxu0 %v1524_v8 }
 0x178   :  { %625 = vmatmul.mubr.bf16.gmra.mrb[44].mxu0 %v1485_v61 }
 0x233   :  { %v596_v63 = vpop.f32.mrb[32].mxu0 }
 0x234   :  { %v597_v0 = vadd.f32 %v596_v63, %v501_v62  ;;  %v598_v1 = vpop.f32.mrb[33].mxu0  ;;  %v1486_v63 = vld [vmem:[%s2017_s5] sm:$0xff]  }
 0x235   :  { %v599_v3 = vadd.f32 %v598_v1, %v501_v62  ;;  %v600_v4 = vpop.f32.mrb[34].mxu0  ;;  %v670_v1 = vpop.permute.xlu0 %669 }
 0x236   :  { %v601_v5 = vadd.f32 %v600_v4, %v506_v2  ;;  %v602_v6 = vpop.f32.mrb[35].mxu0  ;;  %v635_v9 = vmax.f32 %v597_v0, 0.0  ;;  %v1487_v0 = vld [vmem:[%s2017_s5 + $0x8] sm:$0xff]  }
 0x237   :  { %v603_v7 = vadd.f32 %v602_v6, %v506_v2  ;;  %v636_v11 = vmax.f32 %v599_v3, 0.0 }
 0x238   :  { %v637_v10 = vmax.f32 %v601_v5, 0.0  ;;  %v675_v5 = vpop.permute.xlu1 %674 }
 0x239   :  { %v638_v12 = vmax.f32 %v603_v7, 0.0 }
 0x23a   :  { %v651_v13 = vpack.c.bf16 %v637_v10, %v635_v9 }
 0x23b   :  { %v606_v15 = vpop.f32.mrb[36].mxu0  ;;  %v652_v16 = vpack.c.bf16 %v638_v12, %v636_v11 }
 0x23c   :  { %v607_v17 = vadd.f32 %v606_v15, %v511_v14  ;;  %v608_v18 = vpop.f32.mrb[37].mxu0 }
 0x23d   :  { %v609_v20 = vadd.f32 %v608_v18, %v511_v14  ;;  %v610_v21 = vpop.f32.mrb[38].mxu0  ;;  %704 = vmatprep.subr.bf16.mxu1 %v652_v16 }
 0x23e   :  { %v611_v22 = vadd.f32 %v610_v21, %v516_v19  ;;  %v612_v23 = vpop.f32.mrb[39].mxu0  ;;  %705 = vmatpush1.bf16.msra.mxu1 %v651_v13  ;;  %v639_v25 = vmax.f32 %v607_v17, 0.0  ;;  %v680_v17 = vpop.permute.xlu0 %679 }
 0x23f   :  { %v613_v24 = vadd.f32 %v612_v23, %v516_v19  ;;  %v640_v28 = vmax.f32 %v609_v20, 0.0 }
 0x240   :  { %v641_v26 = vmax.f32 %v611_v22, 0.0  ;;  %v685_v22 = vpop.permute.xlu1 %684 }
 0x241   :  { %v642_v29 = vmax.f32 %v613_v24, 0.0 }
 0x242   :  { %v653_v30 = vpack.c.bf16 %v641_v26, %v639_v25 }
 0x243   :  { %v654_v27 = vpack.c.bf16 %v642_v29, %v640_v28  ;;  %v616_v32 = vpop.f32.mrb[40].mxu0 }
 0x244   :  { %v617_v33 = vadd.f32 %v616_v32, %v521_v31  ;;  %v618_v34 = vpop.f32.mrb[41].mxu0 }
 0x245   :  { %v619_v36 = vadd.f32 %v618_v34, %v521_v31  ;;  %v620_v37 = vpop.f32.mrb[42].mxu0  ;;  %706 = vmatprep.subr.bf16.mxu1 %v654_v27  ;;  %v1488_v34 = vld [vmem:[%s2019_s7] sm:$0xff]  }
 0x246   :  { %v621_v38 = vadd.f32 %v620_v37, %v526_v35  ;;  %v622_v39 = vpop.f32.mrb[43].mxu0  ;;  %707 = vmatpush1.bf16.msra.mxu1 %v653_v30  ;;  %v643_v41 = vmax.f32 %v617_v33, 0.0  ;;  %v1491_v37 = vld [vmem:[%s2019_s7 + $0x18] sm:$0xff]  }
 0x247   :  { %v623_v40 = vadd.f32 %v622_v39, %v526_v35  ;;  %v644_v43 = vmax.f32 %v619_v36, 0.0  ;;  %v1489_v35 = vld [vmem:[%s2019_s7 + $0x8] sm:$0xff]   ;;  %v1490_v36 = vld [vmem:[%s2019_s7 + $0x10] sm:$0xff]  }
 0x248   :  { %v645_v42 = vmax.f32 %v621_v38, 0.0  ;;  %v788_v38 = vpop.permute.xlu0 %787 }
 0x249   :  { %v646_v44 = vmax.f32 %v623_v40, 0.0 }
 0x24a   :  { %v655_v45 = vpack.c.bf16 %v645_v42, %v643_v41  ;;  %v793_v42 = vpop.permute.xlu1 %792 }
 0x24b   :  { %v656_v47 = vpack.c.bf16 %v646_v44, %v644_v43  ;;  %v626_v48 = vpop.f32.mrb[44].mxu0 }
 0x24c   :  { %v627_v49 = vadd.f32 %v626_v48, %v531_v46  ;;  %v628_v50 = vpop.f32.mrb[45].mxu0 }
 0x24d   :  { %v629_v52 = vadd.f32 %v628_v50, %v531_v46  ;;  %v630_v53 = vpop.f32.mrb[46].mxu0  ;;  %708 = vmatprep.subr.bf16.mxu1 %v656_v47 }
 0x24e   :  { %v631_v54 = vadd.f32 %v630_v53, %v536_v51  ;;  %v632_v55 = vpop.f32.mrb[47].mxu0  ;;  %709 = vmatpush1.bf16.msra.mxu1 %v655_v45  ;;  %v647_v57 = vmax.f32 %v627_v49, 0.0  ;;  %v798_v53 = vpop.permute.xlu0 %797 }
 0x24f   :  { %v633_v56 = vadd.f32 %v632_v55, %v536_v51  ;;  %v648_v59 = vmax.f32 %v629_v52, 0.0 }
 0x250   :  { %v649_v58 = vmax.f32 %v631_v54, 0.0 }
 0x251   :  { %v650_v60 = vmax.f32 %v633_v56, 0.0 }
 0x252   :  { %v657_v61 = vpack.c.bf16 %v649_v58, %v647_v57  ;;  %v803_v58 = vpop.permute.xlu1 %802 }
 0x253   :  { %v658_v62 = vpack.c.bf16 %v650_v60, %v648_v59 }
 0x255   :  { %710 = vmatprep.subr.bf16.mxu1 %v658_v62 }
 0x256   :  { %711 = vmatpush1.bf16.msra.mxu1 %v657_v61 }
 0x259   :  { %1403 = vmatmul.mubr.msk.bf16.vlgmr.msra.gmra.mrb[0].mxu1 %vm697_vm1, %v1486_v63 }
 0x25a   :  { %746 = vmatprep.mubr.bf16.mxu1 %v1524_v8 }
 0x261   :  { %1404 = vmatmul.mubr.msk.bf16.gmra.mrb[4].mxu1 %vm697_vm1, %v1487_v0 }
 0x262   :  { %890 = vmatprep.mubr.bf16.mxu1 %v1524_v8 }
 0x32c   :  { %v738_v2 = vpop.f32.mrb[0].mxu1 }
 0x32d   :  { %v739_v3 = vadd.f32 %v738_v2, %v670_v1  ;;  %v740_v4 = vpop.f32.mrb[1].mxu1 }
 0x32e   :  { %v741_v6 = vadd.f32 %v740_v4, %v670_v1  ;;  %v742_v7 = vpop.f32.mrb[2].mxu1 }
 0x32f   :  { %v743_v9 = vadd.f32 %v742_v7, %v675_v5  ;;  %v744_v10 = vpop.f32.mrb[3].mxu1  ;;  %v757_v12 = vmax.f32 %v739_v3, 0.0 }
 0x330   :  { %v745_v11 = vadd.f32 %v744_v10, %v675_v5  ;;  %v758_v14 = vmax.f32 %v741_v6, 0.0  ;;  %v808_v5 = vpop.permute.xlu0 %807 }
 0x331   :  { %v759_v13 = vmax.f32 %v743_v9, 0.0 }
 0x332   :  { %v760_v15 = vmax.f32 %v745_v11, 0.0  ;;  %v813_v11 = vpop.permute.xlu1 %812 }
 0x333   :  { %v765_v16 = vpack.c.bf16 %v759_v13, %v757_v12 }
 0x334   :  { %v766_v18 = vpack.c.bf16 %v760_v15, %v758_v14  ;;  %v748_v19 = vpop.f32.mrb[4].mxu1 }
 0x335   :  { %v749_v20 = vadd.f32 %v748_v19, %v680_v17  ;;  %v750_v21 = vpop.f32.mrb[5].mxu1 }
 0x336   :  { %v751_v23 = vadd.f32 %v750_v21, %v680_v17  ;;  %v752_v24 = vpop.f32.mrb[6].mxu1  ;;  %858 = vmatprep.subr.bf16.mxu1 %v766_v18 }
 0x337   :  { %v753_v25 = vadd.f32 %v752_v24, %v685_v22  ;;  %v754_v26 = vpop.f32.mrb[7].mxu1  ;;  %859 = vmatpush1.bf16.msra.mxu1 %v765_v16  ;;  %v761_v29 = vmax.f32 %v749_v20, 0.0 }
 0x338   :  { %v755_v28 = vadd.f32 %v754_v26, %v685_v22  ;;  %v762_v31 = vmax.f32 %v751_v23, 0.0  ;;  %v818_v22 = vpop.permute.xlu0 %817 }
 0x339   :  { %v763_v30 = vmax.f32 %v753_v25, 0.0 }
 0x33a   :  { %v764_v27 = vmax.f32 %v755_v28, 0.0  ;;  %v823_v28 = vpop.permute.xlu1 %822 }
 0x33b   :  { %v767_v32 = vpack.c.bf16 %v763_v30, %v761_v29 }
 0x33c   :  { %v768_v33 = vpack.c.bf16 %v764_v27, %v762_v31 }
 0x33e   :  { %860 = vmatprep.subr.bf16.mxu1 %v768_v33 }
 0x33f   :  { %861 = vmatpush1.bf16.msra.mxu1 %v767_v32 }
 0x342   :  { %1409 = vmatmul.mubr.msk.bf16.vlgmr.msra.gmra.mrb[8].mxu1 %vm845_vm2, %v1488_v34 }
 0x343   :  { %900 = vmatprep.mubr.bf16.mxu1 %v1524_v8 }
 0x34a   :  { %1410 = vmatmul.mubr.msk.bf16.gmra.mrb[12].mxu1 %vm845_vm2, %v1489_v35 }
 0x34b   :  { %910 = vmatprep.mubr.bf16.mxu1 %v1524_v8 }
 0x352   :  { %1411 = vmatmul.mubr.msk.bf16.gmra.mrb[16].mxu1 %vm845_vm2, %v1490_v36 }
 0x353   :  { %920 = vmatprep.mubr.bf16.mxu1 %v1524_v8 }
 0x35a   :  { %1412 = vmatmul.mubr.msk.bf16.gmra.mrb[20].mxu1 %vm845_vm2, %v1491_v37 }
 0x35b   :  { %1163 = vmatprep.mubr.bf16.mxu1 %v1524_v8 }
 0x415   :  { %v892_v39 = vpop.f32.mrb[8].mxu1 }
 0x416   :  { %v893_v40 = vadd.f32 %v892_v39, %v788_v38  ;;  %v894_v41 = vpop.f32.mrb[9].mxu1  ;;  %v1492_v39 = vld [vmem:[%s2021_s9] sm:$0xff]  }
 0x417   :  { %v895_v43 = vadd.f32 %v894_v41, %v788_v38  ;;  %v896_v44 = vpop.f32.mrb[10].mxu1  ;;  %v1494_v41 = vld [vmem:[%s2021_s9 + $0x10] sm:$0xff]  }
 0x418   :  { %v897_v45 = vadd.f32 %v896_v44, %v793_v42  ;;  %v898_v46 = vpop.f32.mrb[11].mxu1  ;;  %v931_v48 = vmax.f32 %v893_v40, 0.0  ;;  %v1493_v40 = vld [vmem:[%s2021_s9 + $0x8] sm:$0xff]  }
 0x419   :  { %v899_v47 = vadd.f32 %v898_v46, %v793_v42  ;;  %v932_v50 = vmax.f32 %v895_v43, 0.0  ;;  %v1495_v42 = vld [vmem:[%s2021_s9 + $0x18] sm:$0xff]   ;;  %v1496_v43 = vld [vmem:[%s2021_s9 + $0x20] sm:$0xff]   ;;  %v1497_v44 = vld [vmem:[%s2021_s9 + $0x28] sm:$0xff]  }
 0x41a   :  { %v933_v49 = vmax.f32 %v897_v45, 0.0  ;;  %v1498_v45 = vld [vmem:[%s2021_s9 + $0x30] sm:$0xff]   ;;  %v1499_v46 = vld [vmem:[%s2021_s9 + $0x38] sm:$0xff]  }
 0x41b   :  { %v934_v51 = vmax.f32 %v899_v47, 0.0  ;;  %v990_v47 = vpop.permute.xlu0 %989 }
 0x41c   :  { %v947_v52 = vpack.c.bf16 %v933_v49, %v931_v48 }
 0x41d   :  { %v948_v54 = vpack.c.bf16 %v934_v51, %v932_v50  ;;  %v902_v55 = vpop.f32.mrb[12].mxu1  ;;  %v995_v51 = vpop.permute.xlu1 %994 }
 0x41e   :  { %v903_v56 = vadd.f32 %v902_v55, %v798_v53  ;;  %v904_v57 = vpop.f32.mrb[13].mxu1 }
 0x41f   :  { %v905_v59 = vadd.f32 %v904_v57, %v798_v53  ;;  %v906_v60 = vpop.f32.mrb[14].mxu1  ;;  %1131 = vmatprep.subr.bf16.mxu1 %v948_v54 }
 0x420   :  { %v907_v61 = vadd.f32 %v906_v60, %v803_v58  ;;  %v908_v62 = vpop.f32.mrb[15].mxu1  ;;  %1132 = vmatpush1.bf16.msra.mxu1 %v947_v52  ;;  %v935_v0 = vmax.f32 %v903_v56, 0.0 }
 0x421   :  { %v909_v63 = vadd.f32 %v908_v62, %v803_v58  ;;  %v936_v2 = vmax.f32 %v905_v59, 0.0  ;;  %v1000_v62 = vpop.permute.xlu0 %999 }
 0x422   :  { %v937_v1 = vmax.f32 %v907_v61, 0.0 }
 0x423   :  { %v938_v3 = vmax.f32 %v909_v63, 0.0 }
 0x424   :  { %v949_v4 = vpack.c.bf16 %v937_v1, %v935_v0 }
 0x425   :  { %v950_v6 = vpack.c.bf16 %v938_v3, %v936_v2  ;;  %v912_v7 = vpop.f32.mrb[16].mxu1  ;;  %v1005_v2 = vpop.permute.xlu1 %1004 }
 0x426   :  { %v913_v9 = vadd.f32 %v912_v7, %v808_v5  ;;  %v914_v10 = vpop.f32.mrb[17].mxu1 }
 0x427   :  { %v915_v12 = vadd.f32 %v914_v10, %v808_v5  ;;  %v916_v13 = vpop.f32.mrb[18].mxu1  ;;  %1133 = vmatprep.subr.bf16.mxu1 %v950_v6 }
 0x428   :  { %v917_v14 = vadd.f32 %v916_v13, %v813_v11  ;;  %v918_v15 = vpop.f32.mrb[19].mxu1  ;;  %1134 = vmatpush1.bf16.msra.mxu1 %v949_v4  ;;  %v939_v17 = vmax.f32 %v913_v9, 0.0 }
 0x429   :  { %v919_v16 = vadd.f32 %v918_v15, %v813_v11  ;;  %v940_v19 = vmax.f32 %v915_v12, 0.0 }
 0x42a   :  { %v941_v18 = vmax.f32 %v917_v14, 0.0  ;;  %v1010_v14 = vpop.permute.xlu0 %1009 }
 0x42b   :  { %v942_v20 = vmax.f32 %v919_v16, 0.0 }
 0x42c   :  { %v951_v21 = vpack.c.bf16 %v941_v18, %v939_v17 }
 0x42d   :  { %v952_v23 = vpack.c.bf16 %v942_v20, %v940_v19  ;;  %v922_v24 = vpop.f32.mrb[20].mxu1  ;;  %v1015_v19 = vpop.permute.xlu1 %1014 }
 0x42e   :  { %v923_v25 = vadd.f32 %v922_v24, %v818_v22  ;;  %v924_v26 = vpop.f32.mrb[21].mxu1 }
 0x42f   :  { %v925_v29 = vadd.f32 %v924_v26, %v818_v22  ;;  %v926_v30 = vpop.f32.mrb[22].mxu1  ;;  %1135 = vmatprep.subr.bf16.mxu1 %v952_v23 }
 0x430   :  { %v927_v31 = vadd.f32 %v926_v30, %v823_v28  ;;  %v928_v27 = vpop.f32.mrb[23].mxu1  ;;  %1136 = vmatpush1.bf16.msra.mxu1 %v951_v21  ;;  %v943_v33 = vmax.f32 %v923_v25, 0.0 }
 0x431   :  { %v929_v32 = vadd.f32 %v928_v27, %v823_v28  ;;  %v944_v35 = vmax.f32 %v925_v29, 0.0 }
 0x432   :  { %v945_v34 = vmax.f32 %v927_v31, 0.0  ;;  %v1020_v31 = vpop.permute.xlu0 %1019 }
 0x433   :  { %v946_v36 = vmax.f32 %v929_v32, 0.0 }
 0x434   :  { %v953_v37 = vpack.c.bf16 %v945_v34, %v943_v33 }
 0x435   :  { %v954_v38 = vpack.c.bf16 %v946_v36, %v944_v35  ;;  %v1025_v35 = vpop.permute.xlu1 %1024 }
 0x437   :  { %1137 = vmatprep.subr.bf16.mxu1 %v954_v38 }
 0x438   :  { %1138 = vmatpush1.bf16.msra.mxu1 %v953_v37 }
 0x43b   :  { %1421 = vmatmul.mubr.msk.bf16.vlgmr.msra.gmra.mrb[24].mxu1 %vm697_vm1, %v1492_v39 }
 0x43c   :  { %1173 = vmatprep.mubr.bf16.mxu1 %v1524_v8 }
 0x443   :  { %1422 = vmatmul.mubr.msk.bf16.gmra.mrb[28].mxu1 %vm697_vm1, %v1493_v40 }
 0x444   :  { %1183 = vmatprep.mubr.bf16.mxu1 %v1524_v8 }
 0x44b   :  { %1423 = vmatmul.mubr.msk.bf16.gmra.mrb[32].mxu1 %vm697_vm1, %v1494_v41 }
 0x44c   :  { %1193 = vmatprep.mubr.bf16.mxu1 %v1524_v8 }
 0x453   :  { %1424 = vmatmul.mubr.msk.bf16.gmra.mrb[36].mxu1 %vm697_vm1, %v1495_v42 }
 0x454   :  { %1203 = vmatprep.mubr.bf16.mxu1 %v1524_v8 }
 0x45b   :  { %1425 = vmatmul.mubr.msk.bf16.gmra.mrb[40].mxu1 %vm697_vm1, %v1496_v43 }
 0x45c   :  { %1213 = vmatprep.mubr.bf16.mxu1 %v1524_v8 }
 0x463   :  { %1426 = vmatmul.mubr.msk.bf16.gmra.mrb[44].mxu1 %vm697_vm1, %v1497_v44 }
 0x464   :  { %1223 = vmatprep.mubr.bf16.mxu1 %v1524_v8 }
 0x46b   :  { %1427 = vmatmul.mubr.msk.bf16.gmra.mrb[48].mxu1 %vm697_vm1, %v1498_v45 }
 0x46c   :  { %1233 = vmatprep.mubr.bf16.mxu1 %v1524_v8 }
 0x473   :  { %1428 = vmatmul.mubr.msk.bf16.gmra.mrb[52].mxu1 %vm697_vm1, %v1499_v46  ;;  %v1030_v46 = vpop.permute.xlu0 %1029 }
 0x474   :  { %1335 = vmatprep.mubr.bf16.mxu1 %v1524_v8 }
 0x50e   :  { %v1165_v48 = vpop.f32.mrb[24].mxu1 }
 0x50f   :  { %v1166_v49 = vadd.f32 %v1165_v48, %v990_v47  ;;  %v1167_v50 = vpop.f32.mrb[25].mxu1 }
 0x510   :  { %v1168_v52 = vadd.f32 %v1167_v50, %v990_v47  ;;  %v1169_v53 = vpop.f32.mrb[26].mxu1 }
 0x511   :  { %v1170_v54 = vadd.f32 %v1169_v53, %v995_v51  ;;  %v1171_v55 = vpop.f32.mrb[27].mxu1  ;;  %v1244_v57 = vmax.f32 %v1166_v49, 0.0 }
 0x512   :  { %v1172_v56 = vadd.f32 %v1171_v55, %v995_v51  ;;  %v1245_v59 = vmax.f32 %v1168_v52, 0.0  ;;  %v1035_v51 = vpop.permute.xlu1 %1034 }
 0x513   :  { %v1246_v58 = vmax.f32 %v1170_v54, 0.0 }
 0x514   :  { %v1247_v60 = vmax.f32 %v1172_v56, 0.0 }
 0x515   :  { %v1276_v61 = vpack.c.bf16 %v1246_v58, %v1244_v57 }
 0x516   :  { %v1277_v63 = vpack.c.bf16 %v1247_v60, %v1245_v59  ;;  %v1175_v0 = vpop.f32.mrb[28].mxu1 }
 0x517   :  { %v1176_v1 = vadd.f32 %v1175_v0, %v1000_v62  ;;  %v1177_v8 = vpop.f32.mrb[29].mxu1 }
 0x518   :  { %v1178_v3 = vadd.f32 %v1177_v8, %v1000_v62  ;;  %v1179_v4 = vpop.f32.mrb[30].mxu1  ;;  %1303 = vmatprep.subr.bf16.mxu1 %v1277_v63  ;;  %v1040_v62 = vpop.permute.xlu0 %1039 }
 0x519   :  { %v1180_v5 = vadd.f32 %v1179_v4, %v1005_v2  ;;  %v1181_v6 = vpop.f32.mrb[31].mxu1  ;;  %1304 = vmatpush1.bf16.msra.mxu1 %v1276_v61  ;;  %v1248_v9 = vmax.f32 %v1176_v1, 0.0 }
 0x51a   :  { %v1182_v7 = vadd.f32 %v1181_v6, %v1005_v2  ;;  %v1249_v11 = vmax.f32 %v1178_v3, 0.0  ;;  %v1045_v2 = vpop.permute.xlu1 %1044 }
 0x51b   :  { %v1250_v10 = vmax.f32 %v1180_v5, 0.0 }
 0x51c   :  { %v1251_v12 = vmax.f32 %v1182_v7, 0.0 }
 0x51d   :  { %v1278_v13 = vpack.c.bf16 %v1250_v10, %v1248_v9 }
 0x51e   :  { %v1279_v15 = vpack.c.bf16 %v1251_v12, %v1249_v11  ;;  %v1185_v16 = vpop.f32.mrb[32].mxu1 }
 0x51f   :  { %v1186_v17 = vadd.f32 %v1185_v16, %v1010_v14  ;;  %v1187_v18 = vpop.f32.mrb[33].mxu1 }
 0x520   :  { %v1188_v20 = vadd.f32 %v1187_v18, %v1010_v14  ;;  %v1189_v21 = vpop.f32.mrb[34].mxu1  ;;  %1305 = vmatprep.subr.bf16.mxu1 %v1279_v15  ;;  %v1050_v14 = vpop.permute.xlu0 %1049 }
 0x521   :  { %v1190_v22 = vadd.f32 %v1189_v21, %v1015_v19  ;;  %v1191_v23 = vpop.f32.mrb[35].mxu1  ;;  %1306 = vmatpush1.bf16.msra.mxu1 %v1278_v13  ;;  %v1252_v25 = vmax.f32 %v1186_v17, 0.0 }
 0x522   :  { %v1192_v24 = vadd.f32 %v1191_v23, %v1015_v19  ;;  %v1253_v28 = vmax.f32 %v1188_v20, 0.0  ;;  %v1055_v19 = vpop.permute.xlu1 %1054 }
 0x523   :  { %v1254_v26 = vmax.f32 %v1190_v22, 0.0 }
 0x524   :  { %v1255_v29 = vmax.f32 %v1192_v24, 0.0 }
 0x525   :  { %v1280_v30 = vpack.c.bf16 %v1254_v26, %v1252_v25 }
 0x526   :  { %v1281_v27 = vpack.c.bf16 %v1255_v29, %v1253_v28  ;;  %v1195_v32 = vpop.f32.mrb[36].mxu1 }
 0x527   :  { %v1196_v33 = vadd.f32 %v1195_v32, %v1020_v31  ;;  %v1197_v34 = vpop.f32.mrb[37].mxu1 }
 0x528   :  { %v1198_v36 = vadd.f32 %v1197_v34, %v1020_v31  ;;  %v1199_v37 = vpop.f32.mrb[38].mxu1  ;;  %1307 = vmatprep.subr.bf16.mxu1 %v1281_v27  ;;  %v1060_v31 = vpop.permute.xlu0 %1059 }
 0x529   :  { %v1200_v38 = vadd.f32 %v1199_v37, %v1025_v35  ;;  %v1201_v39 = vpop.f32.mrb[39].mxu1  ;;  %1308 = vmatpush1.bf16.msra.mxu1 %v1280_v30  ;;  %v1256_v41 = vmax.f32 %v1196_v33, 0.0 }
 0x52a   :  { %v1202_v40 = vadd.f32 %v1201_v39, %v1025_v35  ;;  %v1257_v43 = vmax.f32 %v1198_v36, 0.0  ;;  %v1065_v35 = vpop.permute.xlu1 %1064 }
 0x52b   :  { %v1258_v42 = vmax.f32 %v1200_v38, 0.0 }
 0x52c   :  { %v1259_v44 = vmax.f32 %v1202_v40, 0.0 }
 0x52d   :  { %v1282_v45 = vpack.c.bf16 %v1258_v42, %v1256_v41 }
 0x52e   :  { %v1283_v47 = vpack.c.bf16 %v1259_v44, %v1257_v43  ;;  %v1205_v48 = vpop.f32.mrb[40].mxu1 }
 0x52f   :  { %v1206_v49 = vadd.f32 %v1205_v48, %v1030_v46  ;;  %v1207_v50 = vpop.f32.mrb[41].mxu1  ;;  %v1299_v48 = vlaneseq }
 0x530   :  { %v1208_v52 = vadd.f32 %v1207_v50, %v1030_v46  ;;  %v1209_v53 = vpop.f32.mrb[42].mxu1  ;;  %1309 = vmatprep.subr.bf16.mxu1 %v1283_v47  ;;  %v1292_v47 = vld [vmem:[%s2023_s11] sm:$0x1]  ;;  %v1525_v50 = vmov 1966171168   ;;  %s1500_s11 = scalar_lea.vmem %s1374_s20, 32 }
 0x531   :  { %v1210_v54 = vadd.f32 %v1209_v53, %v1035_v51  ;;  %v1211_v55 = vpop.f32.mrb[43].mxu1  ;;  %1310 = vmatpush1.bf16.msra.mxu1 %v1282_v45  ;;  %v1260_v57 = vmax.f32 %v1206_v49, 0.0  ;;  %v1300_v49 = vshrl.u32 %v1299_v48, 7  ;;  %v1297_v53 = vpop.permute.xlu0 %1296  ;;  %vm1364_vm3 = vcmp.lt.s32.totalorder %v1299_v48, 256  ;;  %p1501_p0 = scmp.ne.s32.totalorder %s1374_s20, %s1500_s11  ;;  %p1506_p2 = scmp.lt.s32.totalorder %s1500_s11, %s1500_s11 }
 0x532   :  { %v1212_v56 = vadd.f32 %v1211_v55, %v1035_v51  ;;  %v1261_v59 = vmax.f32 %v1208_v52, 0.0  ;;  %v1348_v51 = vunpack.c.l.s4 %v1525_v50 }
 0x533   :  { %v1262_v58 = vmax.f32 %v1210_v54, 0.0  ;;  %v1301_v52 = vsub.s32 0, %v1300_v49  ;;  %p1507_p3 = por %p1506_p2, %p1505_p1 }
 0x534   :  { %v1263_v60 = vmax.f32 %v1212_v56, 0.0  ;;  %v1349_v54 = vunpack.c.0.s8 %v1348_v51 }
 0x535   :  { %v1284_v61 = vpack.c.bf16 %v1262_v58, %v1260_v57  ;;  %v1302_v55 = vrot.slane %v1297_v53, %v1301_v52  ;;  %p1508_p4 = pnand %p1507_p3, %p1501_p0 }
 0x536   :  { %v1285_v63 = vpack.c.bf16 %v1263_v60, %v1261_v59  ;;  %v1215_v0 = vpop.f32.mrb[44].mxu1  ;;  %v1352_v60 = vsub.s32 %v1349_v54, %v1300_v49 }
 0x537   :  { %v1216_v1 = vadd.f32 %v1215_v0, %v1040_v62  ;;  %v1217_v8 = vpop.f32.mrb[45].mxu1 }
 0x538   :  { %v1218_v3 = vadd.f32 %v1217_v8, %v1040_v62  ;;  %v1219_v4 = vpop.f32.mrb[46].mxu1  ;;  %1311 = vmatprep.subr.bf16.mxu1 %v1285_v63 }
 0x539   :  { %v1220_v5 = vadd.f32 %v1219_v4, %v1045_v2  ;;  %v1221_v6 = vpop.f32.mrb[47].mxu1  ;;  %1312 = vmatpush1.bf16.msra.mxu1 %v1284_v61  ;;  %v1264_v9 = vmax.f32 %v1216_v1, 0.0 }
 0x53a   :  { %v1222_v7 = vadd.f32 %v1221_v6, %v1045_v2  ;;  %v1265_v11 = vmax.f32 %v1218_v3, 0.0 }
 0x53b   :  { %v1266_v10 = vmax.f32 %v1220_v5, 0.0 }
 0x53c   :  { %v1267_v12 = vmax.f32 %v1222_v7, 0.0 }
 0x53d   :  { %v1286_v13 = vpack.c.bf16 %v1266_v10, %v1264_v9 }
 0x53e   :  { %v1287_v15 = vpack.c.bf16 %v1267_v12, %v1265_v11  ;;  %v1225_v16 = vpop.f32.mrb[48].mxu1 }
 0x53f   :  { %v1226_v17 = vadd.f32 %v1225_v16, %v1050_v14  ;;  %v1227_v18 = vpop.f32.mrb[49].mxu1 }
 0x540   :  { %v1228_v20 = vadd.f32 %v1227_v18, %v1050_v14  ;;  %v1229_v21 = vpop.f32.mrb[50].mxu1  ;;  %1313 = vmatprep.subr.bf16.mxu1 %v1287_v15 }
 0x541   :  { %v1230_v22 = vadd.f32 %v1229_v21, %v1055_v19  ;;  %v1231_v23 = vpop.f32.mrb[51].mxu1  ;;  %1314 = vmatpush1.bf16.msra.mxu1 %v1286_v13  ;;  %v1268_v25 = vmax.f32 %v1226_v17, 0.0 }
 0x542   :  { %v1232_v24 = vadd.f32 %v1231_v23, %v1055_v19  ;;  %v1269_v28 = vmax.f32 %v1228_v20, 0.0 }
 0x543   :  { %v1270_v26 = vmax.f32 %v1230_v22, 0.0 }
 0x544   :  { %v1271_v29 = vmax.f32 %v1232_v24, 0.0 }
 0x545   :  { %v1288_v30 = vpack.c.bf16 %v1270_v26, %v1268_v25 }
 0x546   :  { %v1289_v27 = vpack.c.bf16 %v1271_v29, %v1269_v28  ;;  %v1235_v32 = vpop.f32.mrb[52].mxu1 }
 0x547   :  { %v1236_v33 = vadd.f32 %v1235_v32, %v1060_v31  ;;  %v1237_v34 = vpop.f32.mrb[53].mxu1 }
 0x548   :  { %v1238_v36 = vadd.f32 %v1237_v34, %v1060_v31  ;;  %v1239_v37 = vpop.f32.mrb[54].mxu1  ;;  %1315 = vmatprep.subr.bf16.mxu1 %v1289_v27 }
 0x549   :  { %v1240_v38 = vadd.f32 %v1239_v37, %v1065_v35  ;;  %v1241_v39 = vpop.f32.mrb[55].mxu1  ;;  %1316 = vmatpush1.bf16.msra.mxu1 %v1288_v30  ;;  %v1272_v41 = vmax.f32 %v1236_v33, 0.0 }
 0x54a   :  { %v1242_v40 = vadd.f32 %v1241_v39, %v1065_v35  ;;  %v1273_v43 = vmax.f32 %v1238_v36, 0.0 }
 0x54b   :  { %v1274_v42 = vmax.f32 %v1240_v38, 0.0 }
 0x54c   :  { %v1275_v44 = vmax.f32 %v1242_v40, 0.0 }
 0x54d   :  { %v1290_v45 = vpack.c.bf16 %v1274_v42, %v1272_v41 }
 0x54e   :  { %v1291_v46 = vpack.c.bf16 %v1275_v44, %v1273_v43 }
 0x550   :  { %1317 = vmatprep.subr.bf16.mxu1 %v1291_v46 }
 0x551   :  { %1318 = vmatpush1.bf16.msra.mxu1 %v1290_v45 }
 0x554   :  { %1336 = vmatmul.mubr.bf16.vlgmr.msra.gmra.mrb[56].mxu1 %v1292_v47 }
 0x627   :  { %v1337_v56 = vpop.f32.mrb[56].mxu1 }
 0x628   :  { %v1338_v57 = vadd.f32 %v1337_v56, %v1302_v55  ;;  %v1339_v58 = vpop.f32.mrb[57].mxu1 }
 0x629   :  { %v1340_v59 = vadd.f32 %v1339_v58, %v1302_v55  ;;  %v1341_v61 = vpop.f32.mrb[58].mxu1 }
 0x62a   :  { %v1342_v62 = vpop.f32.mrb[59].mxu1 }
 0x62b   :  { %v1346_v63 = vcombine.low %v1338_v57, %v1340_v59 }
 0x62d   :  { %v1353_v0 = vrot.slane %v1346_v63, %v1352_v60 }
 0x62f   :  { %v1360_v1 = vrot.slane %v1353_v0, %v1352_v60 }
 0x631   :  { %1366 = vst.msk [vmem:[#allocation3] sm:$0x3] %vm1364_vm3, %v1360_v1 }
 0x632   :  { %1511 = shalt.err (!%p1508_p4)
}
 0x633   :  { %s1512_s22 = scalar_lea.hbm %s2025_s13, 32 }
 0x634   :  { %p1513_p5 = scmp.ne.s32.totalorder %s2025_s13, %s1512_s22  ;;  %p1516_p6 = scmp.lt.u32.totalorder %s1512_s22, %s2025_s13 }
 0x636   :  { %p1518_p7 = pnand %p1516_p6, %p1513_p5 }
 0x638   :  { %1521 = shalt.err (!%p1518_p7)
}
 0x639   :  { %1376 = dma.vmem_to_hbm [thread:$0]  %s1374_s20, 32, %s2025_s13, [#allocation4]  }
 0x63a   :  { %1522 = dma.done.wait [#allocation4], 32  }
 0x63b   :  { %1523 = vsyncadd [#allocation4], 4294967264 }
 0x63c   :  { %1380 = vsyncpa [#allocation4], 1 }

</bundles_post_ra>
